<compile_context>
chip_gen: v6e
topology: v6e:2x2x1
jax: 0.10.0
libtpu: 0.0.40
codegen_flags: <defaults>
</compile_context>

<pallas_src>
import jax
import jax.numpy as jnp
from jax import lax
from jax.experimental import pallas as pl
from jax.experimental.pallas import tpu as pltpu


def _fused_conv3x3_kernel(x_ref, w_ref, o_ref):
    """Fused key+value 3x3 'same' conv via per-tap MXU accumulation.

    x_ref: (Bt, H+2, W+2, Cin)  bf16 halo-padded input tile (Bt batch elems)
    w_ref: (9*Cin, Cpad)        bf16 [key|value] weights, tap-major
                                (kh outer, kw inner), Cout zero-padded to Cpad
    o_ref: (Bt, H*W, Cpad)      lane-dense output (Cpad % 128 == 0)
    """
    Bt, Hp2, Wp2, Cin = x_ref.shape
    H, W = Hp2 - 2, Wp2 - 2
    M = Bt * H * W
    Cpad = o_ref.shape[-1]

    x = x_ref[...]
    w = w_ref[...]          # resident weights, loaded once per grid step

    # Per-tap accumulation: no (M, 9*Cin) patch / concatenate is ever built.
    # Tap order (kh outer, kw inner) matches the (3,3,Cin,Cout)->(9*Cin,Cout)
    # weight flattening done in the wrapper.  Static Python unroll (9 taps).
    acc = None
    for tap in range(9):
        kh, kw = divmod(tap, 3)
        xt = x[:, kh:kh + H, kw:kw + W, :].reshape(M, Cin)
        wt = w[tap * Cin:(tap + 1) * Cin, :]          # sublane-aligned slice
        d = jnp.dot(xt, wt, preferred_element_type=jnp.float32)
        acc = d if acc is None else acc + d

    o_ref[...] = acc.reshape(Bt, H * W, Cpad).astype(o_ref.dtype)


def _min_grid_steps():
    """>=2 grid steps on v7x so both TensorCores get work; 1 elsewhere
    (v5e/v6e have a single TC, so extra grid steps are pure overhead)."""
    try:
        kind = jax.devices()[0].device_kind.lower()
    except Exception:
        return 1
    return 2 if "v7" in kind else 1


def _pick_batch_tile(n, h, w, cin, cpad, out_bytes_per_elem,
                     target_m=512, min_steps=1,
                     vmem_budget_bytes=24 << 20):
    """Largest divisor Bt of n such that:
       * the double-buffered per-step VMEM footprint fits the budget,
       * Bt*(h*w) <= target_m (per-step MXU M target),
       * the grid keeps at least min_steps steps (v7x megacore) if possible.
    """
    hw = h * w

    def footprint(bt):
        in_tile = bt * (h + 2) * (w + 2) * cin * 2           # bf16 input
        out_tile = bt * hw * cpad * out_bytes_per_elem       # output tile
        w_buf = 9 * cin * cpad * 2                           # bf16 weights
        return 2 * (in_tile + out_tile) + 2 * w_buf          # double buffered

    best = 1
    for d in range(1, n + 1):
        if n % d:
            continue
        if footprint(d) > vmem_budget_bytes:
            continue
        if d * hw <= target_m and (n // d) >= min_steps:
            best = d
    return best


def fused_key_value_conv(x_nchw, key_w_hwio, value_w_hwio,
                         out_dtype=jnp.float32):
    """Key/value 3x3 stride-1 'same' convs (no bias), fused in one pallas_call.

    x_nchw: (N, Cin, H, W) f32.  key_w/value_w: (3, 3, Cin, Ck/Cv) f32 (HWIO).
    Returns (key, value) as NCHW `out_dtype`, matching the PyTorch module
    layout (out_dtype=f32 by default for parity; bf16 halves output HBM
    traffic if downstream tolerates it).
    """
    N, Cin, H, W = x_nchw.shape
    Ck = key_w_hwio.shape[-1]
    Cv = value_w_hwio.shape[-1]
    Ctot = Ck + Cv
    Cpad = ((Ctot + 127) // 128) * 128    # lane-dense stores / aligned MXU N

    # Layout glue, done exactly once: NCHW->NHWC, halo pad, bf16 cast,
    # weight fuse + flatten + pad.
    x = jnp.transpose(x_nchw, (0, 2, 3, 1)).astype(jnp.bfloat16)
    x_pad = jnp.pad(x, ((0, 0), (1, 1), (1, 1), (0, 0)))

    w = jnp.concatenate([key_w_hwio, value_w_hwio], axis=-1)       # (3,3,Cin,Ctot)
    w = jnp.pad(w, ((0, 0), (0, 0), (0, 0), (0, Cpad - Ctot)))
    w = w.reshape(9 * Cin, Cpad).astype(jnp.bfloat16)

    Bt = _pick_batch_tile(
        N, H, W, Cin, Cpad,
        out_bytes_per_elem=jnp.dtype(out_dtype).itemsize,
        min_steps=_min_grid_steps())
    grid = (N // Bt,)

    out = pl.pallas_call(
        _fused_conv3x3_kernel,
        out_shape=jax.ShapeDtypeStruct((N, H * W, Cpad), out_dtype),
        grid_spec=pltpu.PrefetchScalarGridSpec(
            num_scalar_prefetch=0,
            grid=grid,
            in_specs=[
                # Bt halo-padded images per grid step.
                pl.BlockSpec((Bt, H + 2, W + 2, Cin), lambda n: (n, 0, 0, 0)),
                # Fused weights, same block every step (revisit -> no re-DMA).
                pl.BlockSpec((9 * Cin, Cpad), lambda n: (0, 0)),
            ],
            out_specs=pl.BlockSpec((Bt, H * W, Cpad), lambda n: (n, 0, 0)),
        ),
        compiler_params=pltpu.CompilerParams(
            # batch-tile axis parallel so both v7x TensorCores are used when
            # there is more than one grid step (no effect on v5e/v6e).
            dimension_semantics=("parallel",),
            # Explicit, generation-safe VMEM cap (<= every chip's physical
            # VMEM); the tile picker budgets 24 MiB underneath it.
            vmem_limit_bytes=32 << 20),
    )(x_pad, w)

    out = out.reshape(N, H, W, Cpad)
    # NHWC -> NCHW to match the PyTorch module's output layout.
    key = jnp.transpose(out[..., :Ck], (0, 3, 1, 2))
    value = jnp.transpose(out[..., Ck:Ctot], (0, 3, 1, 2))
    return key, value


class AttMemoryModuleDoublePallas:
    """JAX/Pallas port of AttMemoryModule_Double (Conv2d weights, no bias)."""

    def __init__(self, fc_dim=64, att_fc_dim=32, key=None):
        if key is None:
            key = jax.random.PRNGKey(0)
        k1, k2 = jax.random.split(key)
        # Deterministic synthetic init (Kaiming-like scale), HWIO layout.
        fan_in = att_fc_dim * 3 * 3
        scale = 1.0 / jnp.sqrt(fan_in)
        self.key_w = scale * jax.random.normal(
            k1, (3, 3, att_fc_dim, fc_dim // 4), jnp.float32)
        self.value_w = scale * jax.random.normal(
            k2, (3, 3, att_fc_dim, fc_dim), jnp.float32)
        self.out_dim = fc_dim

    def __call__(self, conv_out):
        # conv_out: list of NCHW tensors; only the last one is used.
        conv5_nchw = conv_out[-1]
        return fused_key_value_conv(conv5_nchw, self.key_w, self.value_w)


def _ref_conv_nhwc(x_nhwc, w_hwio):
    # Reference matching the kernel's bf16-input / f32-accumulate numerics.
    return lax.conv_general_dilated(
        x_nhwc, w_hwio, window_strides=(1, 1), padding="SAME",
        dimension_numbers=("NHWC", "HWIO", "NHWC"),
        precision=lax.Precision.HIGHEST)


if __name__ == "__main__":
    # Small shapes consistent with the module: batch=2, att_fc_dim=32,
    # fc_dim=64 (key -> 16 channels, value -> 64), spatial 8x8.
    N, att_fc_dim, fc_dim, H, W = 2, 32, 64, 8, 8

    rng = jax.random.PRNGKey(0)
    k_x, k_params = jax.random.split(rng)
    conv5 = jax.random.normal(k_x, (N, att_fc_dim, H, W), jnp.float32)  # NCHW

    module = AttMemoryModuleDoublePallas(fc_dim=fc_dim, att_fc_dim=att_fc_dim,
                                         key=k_params)

    key_out, value_out = module([conv5])
    key_out = jax.block_until_ready(key_out)
    value_out = jax.block_until_ready(value_out)

    # Correctness check against a plain-JAX conv reference using the same
    # bf16-rounded inputs (kernel multiplies in bf16, accumulates in f32).
    x_nhwc = jnp.transpose(conv5, (0, 2, 3, 1)).astype(jnp.bfloat16).astype(jnp.float32)
    key_w_b = module.key_w.astype(jnp.bfloat16).astype(jnp.float32)
    value_w_b = module.value_w.astype(jnp.bfloat16).astype(jnp.float32)
    key_ref = jnp.transpose(_ref_conv_nhwc(x_nhwc, key_w_b), (0, 3, 1, 2))
    value_ref = jnp.transpose(_ref_conv_nhwc(x_nhwc, value_w_b), (0, 3, 1, 2))

    assert key_out.shape == (N, fc_dim // 4, H, W)
    assert value_out.shape == (N, fc_dim, H, W)
    assert jnp.allclose(key_out, key_ref, atol=2e-3, rtol=2e-3)
    assert jnp.allclose(value_out, value_ref, atol=2e-3, rtol=2e-3)

    print("KERNEL_OK")
</pallas_src>

<mosaic_0001>
module attributes {stable_mosaic.version = 11 : i64} {
  func.func @_fused_conv3x3_kernel(%arg0: i32, %arg1: memref<2x10x10x32xbf16, #tpu.memory_space<vmem>>, %arg2: memref<288x128xbf16, #tpu.memory_space<vmem>>, %arg3: memref<2x64x128xf32, #tpu.memory_space<vmem>>) attributes {dimension_semantics = [#tpu.dimension_semantics<parallel>], iteration_bounds = array<i64: 1>, scalar_prefetch = 0 : i64, scratch_operands = 0 : i64, tpu.core_type = #tpu.core_type<tc>, window_params = [{transform_indices = @transform_0, window_bounds = array<i64: 2, 10, 10, 32>}, {pipeline_mode = #tpu.pipeline_mode<synchronous>, transform_indices = @transform_1, window_bounds = array<i64: 288, 128>}, {transform_indices = @transform_2, window_bounds = array<i64: 2, 64, 128>}]} {
    %c0 = arith.constant 0 : index
    %c0_0 = arith.constant 0 : index
    %c0_1 = arith.constant 0 : index
    %c0_2 = arith.constant 0 : index
    %0 = vector.load %arg1[%c0, %c0_0, %c0_1, %c0_2] : memref<2x10x10x32xbf16, #tpu.memory_space<vmem>>, vector<2x10x10x32xbf16>
    %c0_3 = arith.constant 0 : index
    %c0_4 = arith.constant 0 : index
    %1 = vector.load %arg2[%c0_3, %c0_4] : memref<288x128xbf16, #tpu.memory_space<vmem>>, vector<288x128xbf16>
    %2 = vector.extract_strided_slice %0 {offsets = [0, 0, 0, 0], sizes = [2, 8, 8, 32], strides = [1, 1, 1, 1]} : vector<2x10x10x32xbf16> to vector<2x8x8x32xbf16>
    %3 = vector.shape_cast %2 : vector<2x8x8x32xbf16> to vector<128x32xbf16>
    %4 = vector.extract_strided_slice %1 {offsets = [0, 0], sizes = [32, 128], strides = [1, 1]} : vector<288x128xbf16> to vector<32x128xbf16>
    %cst = arith.constant dense<0.000000e+00> : vector<128x128xf32>
    %5 = tpu.matmul %3, %4, %cst {dimension_numbers = #tpu.dot_dimension_numbers<[1], [0], [0], [1], [0, 0, 1, 1], [], []>} : vector<128x32xbf16>, vector<32x128xbf16>, vector<128x128xf32> -> vector<128x128xf32>
    %6 = vector.extract_strided_slice %0 {offsets = [0, 0, 1, 0], sizes = [2, 8, 8, 32], strides = [1, 1, 1, 1]} : vector<2x10x10x32xbf16> to vector<2x8x8x32xbf16>
    %7 = vector.shape_cast %6 : vector<2x8x8x32xbf16> to vector<128x32xbf16>
    %8 = vector.extract_strided_slice %1 {offsets = [32, 0], sizes = [32, 128], strides = [1, 1]} : vector<288x128xbf16> to vector<32x128xbf16>
    %cst_5 = arith.constant dense<0.000000e+00> : vector<128x128xf32>
    %9 = tpu.matmul %7, %8, %cst_5 {dimension_numbers = #tpu.dot_dimension_numbers<[1], [0], [0], [1], [0, 0, 1, 1], [], []>} : vector<128x32xbf16>, vector<32x128xbf16>, vector<128x128xf32> -> vector<128x128xf32>
    %10 = arith.addf %5, %9 : vector<128x128xf32>
    %11 = vector.extract_strided_slice %0 {offsets = [0, 0, 2, 0], sizes = [2, 8, 8, 32], strides = [1, 1, 1, 1]} : vector<2x10x10x32xbf16> to vector<2x8x8x32xbf16>
    %12 = vector.shape_cast %11 : vector<2x8x8x32xbf16> to vector<128x32xbf16>
    %13 = vector.extract_strided_slice %1 {offsets = [64, 0], sizes = [32, 128], strides = [1, 1]} : vector<288x128xbf16> to vector<32x128xbf16>
    %cst_6 = arith.constant dense<0.000000e+00> : vector<128x128xf32>
    %14 = tpu.matmul %12, %13, %cst_6 {dimension_numbers = #tpu.dot_dimension_numbers<[1], [0], [0], [1], [0, 0, 1, 1], [], []>} : vector<128x32xbf16>, vector<32x128xbf16>, vector<128x128xf32> -> vector<128x128xf32>
    %15 = arith.addf %10, %14 : vector<128x128xf32>
    %16 = vector.extract_strided_slice %0 {offsets = [0, 1, 0, 0], sizes = [2, 8, 8, 32], strides = [1, 1, 1, 1]} : vector<2x10x10x32xbf16> to vector<2x8x8x32xbf16>
    %17 = vector.shape_cast %16 : vector<2x8x8x32xbf16> to vector<128x32xbf16>
    %18 = vector.extract_strided_slice %1 {offsets = [96, 0], sizes = [32, 128], strides = [1, 1]} : vector<288x128xbf16> to vector<32x128xbf16>
    %cst_7 = arith.constant dense<0.000000e+00> : vector<128x128xf32>
    %19 = tpu.matmul %17, %18, %cst_7 {dimension_numbers = #tpu.dot_dimension_numbers<[1], [0], [0], [1], [0, 0, 1, 1], [], []>} : vector<128x32xbf16>, vector<32x128xbf16>, vector<128x128xf32> -> vector<128x128xf32>
    %20 = arith.addf %15, %19 : vector<128x128xf32>
    %21 = vector.extract_strided_slice %0 {offsets = [0, 1, 1, 0], sizes = [2, 8, 8, 32], strides = [1, 1, 1, 1]} : vector<2x10x10x32xbf16> to vector<2x8x8x32xbf16>
    %22 = vector.shape_cast %21 : vector<2x8x8x32xbf16> to vector<128x32xbf16>
    %23 = vector.extract_strided_slice %1 {offsets = [128, 0], sizes = [32, 128], strides = [1, 1]} : vector<288x128xbf16> to vector<32x128xbf16>
    %cst_8 = arith.constant dense<0.000000e+00> : vector<128x128xf32>
    %24 = tpu.matmul %22, %23, %cst_8 {dimension_numbers = #tpu.dot_dimension_numbers<[1], [0], [0], [1], [0, 0, 1, 1], [], []>} : vector<128x32xbf16>, vector<32x128xbf16>, vector<128x128xf32> -> vector<128x128xf32>
    %25 = arith.addf %20, %24 : vector<128x128xf32>
    %26 = vector.extract_strided_slice %0 {offsets = [0, 1, 2, 0], sizes = [2, 8, 8, 32], strides = [1, 1, 1, 1]} : vector<2x10x10x32xbf16> to vector<2x8x8x32xbf16>
    %27 = vector.shape_cast %26 : vector<2x8x8x32xbf16> to vector<128x32xbf16>
    %28 = vector.extract_strided_slice %1 {offsets = [160, 0], sizes = [32, 128], strides = [1, 1]} : vector<288x128xbf16> to vector<32x128xbf16>
    %cst_9 = arith.constant dense<0.000000e+00> : vector<128x128xf32>
    %29 = tpu.matmul %27, %28, %cst_9 {dimension_numbers = #tpu.dot_dimension_numbers<[1], [0], [0], [1], [0, 0, 1, 1], [], []>} : vector<128x32xbf16>, vector<32x128xbf16>, vector<128x128xf32> -> vector<128x128xf32>
    %30 = arith.addf %25, %29 : vector<128x128xf32>
    %31 = vector.extract_strided_slice %0 {offsets = [0, 2, 0, 0], sizes = [2, 8, 8, 32], strides = [1, 1, 1, 1]} : vector<2x10x10x32xbf16> to vector<2x8x8x32xbf16>
    %32 = vector.shape_cast %31 : vector<2x8x8x32xbf16> to vector<128x32xbf16>
    %33 = vector.extract_strided_slice %1 {offsets = [192, 0], sizes = [32, 128], strides = [1, 1]} : vector<288x128xbf16> to vector<32x128xbf16>
    %cst_10 = arith.constant dense<0.000000e+00> : vector<128x128xf32>
    %34 = tpu.matmul %32, %33, %cst_10 {dimension_numbers = #tpu.dot_dimension_numbers<[1], [0], [0], [1], [0, 0, 1, 1], [], []>} : vector<128x32xbf16>, vector<32x128xbf16>, vector<128x128xf32> -> vector<128x128xf32>
    %35 = arith.addf %30, %34 : vector<128x128xf32>
    %36 = vector.extract_strided_slice %0 {offsets = [0, 2, 1, 0], sizes = [2, 8, 8, 32], strides = [1, 1, 1, 1]} : vector<2x10x10x32xbf16> to vector<2x8x8x32xbf16>
    %37 = vector.shape_cast %36 : vector<2x8x8x32xbf16> to vector<128x32xbf16>
    %38 = vector.extract_strided_slice %1 {offsets = [224, 0], sizes = [32, 128], strides = [1, 1]} : vector<288x128xbf16> to vector<32x128xbf16>
    %cst_11 = arith.constant dense<0.000000e+00> : vector<128x128xf32>
    %39 = tpu.matmul %37, %38, %cst_11 {dimension_numbers = #tpu.dot_dimension_numbers<[1], [0], [0], [1], [0, 0, 1, 1], [], []>} : vector<128x32xbf16>, vector<32x128xbf16>, vector<128x128xf32> -> vector<128x128xf32>
    %40 = arith.addf %35, %39 : vector<128x128xf32>
    %41 = vector.extract_strided_slice %0 {offsets = [0, 2, 2, 0], sizes = [2, 8, 8, 32], strides = [1, 1, 1, 1]} : vector<2x10x10x32xbf16> to vector<2x8x8x32xbf16>
    %42 = vector.shape_cast %41 : vector<2x8x8x32xbf16> to vector<128x32xbf16>
    %43 = vector.extract_strided_slice %1 {offsets = [256, 0], sizes = [32, 128], strides = [1, 1]} : vector<288x128xbf16> to vector<32x128xbf16>
    %cst_12 = arith.constant dense<0.000000e+00> : vector<128x128xf32>
    %44 = tpu.matmul %42, %43, %cst_12 {dimension_numbers = #tpu.dot_dimension_numbers<[1], [0], [0], [1], [0, 0, 1, 1], [], []>} : vector<128x32xbf16>, vector<32x128xbf16>, vector<128x128xf32> -> vector<128x128xf32>
    %45 = arith.addf %40, %44 : vector<128x128xf32>
    %46 = vector.shape_cast %45 : vector<128x128xf32> to vector<2x64x128xf32>
    %c0_13 = arith.constant 0 : index
    %c0_14 = arith.constant 0 : index
    %c0_15 = arith.constant 0 : index
    %47 = vector.load %arg3[%c0_13, %c0_14, %c0_15] : memref<2x64x128xf32, #tpu.memory_space<vmem>>, vector<2x64x128xf32>
    tpu.vector_store %arg3[%c0_13, %c0_14, %c0_15], %46 {strides = array<i32>} : memref<2x64x128xf32, #tpu.memory_space<vmem>>, vector<2x64x128xf32>,
    return
  }
  func.func @transform_0(%arg0: i32) -> (i32, i32, i32, i32) {
    %c0_i32 = arith.constant 0 : i32
    %c0_i32_0 = arith.constant 0 : i32
    %c0_i32_1 = arith.constant 0 : i32
    %c0_i32_2 = arith.constant 0 : i32
    return %arg0, %c0_i32, %c0_i32_0, %c0_i32_1 : i32, i32, i32, i32
  }
  func.func @transform_1(%arg0: i32) -> (i32, i32) {
    %c0_i32 = arith.constant 0 : i32
    %c0_i32_0 = arith.constant 0 : i32
    %c0_i32_1 = arith.constant 0 : i32
    return %c0_i32, %c0_i32_0 : i32, i32
  }
  func.func @transform_2(%arg0: i32) -> (i32, i32, i32) {
    %c0_i32 = arith.constant 0 : i32
    %c0_i32_0 = arith.constant 0 : i32
    %c0_i32_1 = arith.constant 0 : i32
    return %arg0, %c0_i32, %c0_i32_0 : i32, i32, i32
  }
}

</mosaic_0001>

<bundles_post_ra>
// kernel: tpu_custom_call.1
= control target key start
LH: loop header
LB: loop body
LE: loop exit
PB: predicated region body
PF: predicated region fallthrough
CT: control target
= control target key end

     0   :  { %vm89_vm0 = vsmask.f32 3328  ;;  %vm90_vm1 = vsmask.f32 7440  ;;  %vm352_vm3 = vcmask 261120   ;;  %vm663_vm4 = vcmask 1042432   ;;  %s3396_s0 = inlined_call_operand.vmem [shape: bf16[2,10,10,32], index: 0, kind: input, shape index: {}]   ;;  %s3397_s1 = inlined_call_operand.vmem [shape: bf16[288,128], index: 1, kind: input, shape index: {}]   ;;  %s3398_s2 = inlined_call_operand.hbm [shape: f32[2,64,128], index: 2, kind: output, shape index: {}]  }
   0x1   :  { %v2338_v0 = vld [vmem:[%s3397_s1 + $0x18] sm:$0xff]   ;;  %v2339_v1 = vld [vmem:[%s3397_s1 + $0x10] sm:$0xff]   ;;  %v2423_v2 = vld [vmem:[%s3396_s0] sm:$0xf]  ;;  %vm664_vm5 = vcmask 1046532  }
   0x2   :  { %2331 = vmatprep.subr.bf16.mxu1 %v2338_v0  ;;  %2151 = vmatprep.subr.bf16.mxu0 %v2338_v0  ;;  %v2428_v3 = vld [vmem:[%s3396_s0 + $0x4] sm:$0x1]  ;;  %v2433_v4 = vld [vmem:[%s3396_s0 + $0x8] sm:$0xf]  ;;  %v2438_v5 = vld [vmem:[%s3396_s0 + $0x10] sm:$0xf] }
   0x3   :  { %2333 = vmatpush3.bf16.msra.mxu1 %v2338_v0  ;;  %2152 = vmatpush3.bf16.msra.mxu0 %v2338_v0  ;;  %v2443_v6 = vld [vmem:[%s3396_s0 + $0xc] sm:$0x1]  ;;  %v2448_v7 = vld [vmem:[%s3396_s0 + $0x18] sm:$0xf]  ;;  %v2453_v8 = vld [vmem:[%s3396_s0 + $0x20] sm:$0xf] }
   0x4   :  { %2332 = vmatprep.subr.bf16.mxu1 %v2339_v1  ;;  %2153 = vmatprep.subr.bf16.mxu0 %v2339_v1  ;;  %v2462_v11 = vld [vmem:[%s3396_s0 + $0x14] sm:$0x1]  ;;  %v93_v12 = vshrl.u32 %v2423_v2, 16  ;;  %v96_v13 = vshll.u32 %v2423_v2, 16  ;;  %v102_v14 = vshll.u32 %v2428_v3, 16  ;;  %v107_v15 = vshrl.u32 %v2433_v4, 16  ;;  %vm2486_vm2 = vmor %vm89_vm0, %vm90_vm1 }
   0x5   :  { %v2471_v16 = vld [vmem:[%s3396_s0 + $0x1c] sm:$0x1]  ;;  %v110_v17 = vshll.u32 %v2433_v4, 16  ;;  %v116_v18 = vshll.u32 %v2443_v6, 16  ;;  %v121_v19 = vshrl.u32 %v2438_v5, 16  ;;  %v124_v20 = vshll.u32 %v2438_v5, 16  ;;  %vm2740_vm6 = vmor %vm663_vm4, %vm664_vm5 }
   0x6   :  { %v95_v21 = vrot.slane %v93_v12, 4  ;;  %v98_v22 = vrot.slane %v96_v13, 5  ;;  %v109_v23 = vrot.slane %v107_v15, 4  ;;  %v104_v24 = vrot.slane %v102_v14, 5  ;;  %v2483_v32 = vld [vmem:[%s3397_s1 + $0x8] sm:$0xff]   ;;  %v2343_v15 = vld [vmem:[%s3397_s1 + $0x20] sm:$0xff]  }
   0x7   :  { %2334 = vmatpush3.bf16.msra.mxu1 %v2339_v1  ;;  %2154 = vmatpush3.bf16.msra.mxu0 %v2339_v1  ;;  %v112_v25 = vrot.slane %v110_v17, 5  ;;  %v123_v26 = vrot.slane %v121_v19, 4  ;;  %v126_v27 = vrot.slane %v124_v20, 5  ;;  %v130_v29 = vshll.u32 %v2462_v11, 16  ;;  %v2494_v38 = vld [vmem:[%s3396_s0 + $0x24] sm:$0x1] }
   0x8   :  { %v99_v28 = vor.u32 %v98_v22, %v95_v21  ;;  %v135_v30 = vshrl.u32 %v2448_v7, 16  ;;  %v138_v31 = vshll.u32 %v2448_v7, 16  ;;  %v118_v35 = vrot.slane %v116_v18, 5  ;;  %2171 = vmatprep.subr.bf16.mxu1 %v2483_v32  ;;  %v2341_v51 = vld [vmem:[%s3397_s1 + $0x28] sm:$0xff]   ;;  %v2517_v56 = vld [vmem:[%s3396_s0 + $0x50] sm:$0xf] }
   0x9   :  { %v113_v34 = vor.u32 %v112_v25, %v109_v23  ;;  %v127_v36 = vor.u32 %v126_v27, %v123_v26  ;;  %v144_v37 = vshll.u32 %v2471_v16, 16  ;;  %v132_v40 = vrot.slane %v130_v29, 5  ;;  %v2522_v57 = vld [vmem:[%s3396_s0 + $0x54] sm:$0x1]  ;;  %v2527_v58 = vld [vmem:[%s3396_s0 + $0x58] sm:$0xf]  ;;  %2191 = vmatprep.subr.bf16.mxu0 %v2341_v51 }
   0xa   :  { %v100_v39 = vrot.slane %v99_v28, 4  ;;  %v137_v41 = vrot.slane %v135_v30, 4  ;;  %v140_v42 = vrot.slane %v138_v31, 5  ;;  %v149_v45 = vshrl.u32 %v2453_v8, 16  ;;  %v2537_v62 = vld [vmem:[%s3396_s0 + $0x5c] sm:$0x1] }
   0xb   :  { %v114_v43 = vrot.slane %v113_v34, 4  ;;  %v128_v44 = vrot.slane %v127_v36, 4  ;;  %v146_v48 = vrot.slane %v144_v37, 5  ;;  %v152_v49 = vshll.u32 %v2453_v8, 16  ;;  %v2542_v63 = vld [vmem:[%s3396_s0 + $0x60] sm:$0xf] }
   0xc   :  { %v105_v46 = vsel %vm2486_vm2, %v100_v39, %v104_v24  ;;  %v141_v47 = vor.u32 %v140_v42, %v137_v41  ;;  %v158_v54 = vshll.u32 %v2494_v38, 16  ;;  %v151_v60 = vrot.slane %v149_v45, 4  ;;  %v2551_v1 = vld [vmem:[%s3396_s0 + $0x64] sm:$0x1]  ;;  %v2556_v12 = vld [vmem:[%s3396_s0 + $0x68] sm:$0xf] }
   0xd   :  { %v2503_v50 = vsel %vm2486_vm2, %v114_v43, %v118_v35  ;;  %v2510_v52 = vsel %vm2486_vm2, %v128_v44, %v132_v40  ;;  %v154_v61 = vrot.slane %v152_v49, 5  ;;  %v205_v13 = vshrl.u32 %v2517_v56, 16  ;;  %v2575_v29 = vld [vmem:[%s3396_s0 + $0x6c] sm:$0x1] }
   0xe   :  { %v142_v53 = vrot.slane %v141_v47, 4  ;;  %v1897_v55 = vcombine.low %v105_v46, %v2503_v50  ;;  %v208_v14 = vshll.u32 %v2517_v56, 16  ;;  %v160_v17 = vrot.slane %v158_v54, 5  ;;  %v2581_v36 = vld [vmem:[%s3397_s1 + $0x48] sm:$0xff]  }
   0xf   :  { %v214_v19 = vshll.u32 %v2522_v57, 16  ;;  %v219_v20 = vshrl.u32 %v2527_v58, 16  ;;  %v207_v22 = vrot.slane %v205_v13, 4  ;;  %v222_v24 = vshll.u32 %v2527_v58, 16  ;;  %v2725_v21 = vld [vmem:[%s3396_s0 + $0x8c] sm:$0x1] }
  0x10   :  { %v2531_v59 = vsel %vm2486_vm2, %v142_v53, %v146_v48  ;;  %2155 = vmatprep.mubr.msk.bf16.mxu0 %vm352_vm3, %v1897_v55  ;;  %v210_v23 = vrot.slane %v208_v14, 5  ;;  %v155_v25 = vor.u32 %v154_v61, %v151_v60  ;;  %v228_v28 = vshll.u32 %v2537_v62, 16  ;;  %v2599_v60 = vld [vmem:[%s3396_s0 + $0x2c] sm:$0x1]  ;;  %v2604_v61 = vld [vmem:[%s3396_s0 + $0x70] sm:$0xf] }
  0x11   :  { %v2546_v0 = vcombine.low %v2510_v52, %v2531_v59  ;;  %v221_v27 = vrot.slane %v219_v20, 4  ;;  %v216_v31 = vrot.slane %v214_v19, 5  ;;  %v224_v34 = vrot.slane %v222_v24, 5  ;;  %v2610_v20 = vld [vmem:[%s3396_s0 + $0x74] sm:$0x1] }
  0x12   :  { %v211_v30 = vor.u32 %v210_v23, %v207_v22  ;;  %v233_v35 = vshrl.u32 %v2542_v63, 16  ;;  %v230_v37 = vrot.slane %v228_v28, 5  ;;  %v236_v39 = vshll.u32 %v2542_v63, 16 }
  0x13   :  { %3415 = vst [vmem:[#allocation5_spill] sm:$0xff] %v2546_v0  ;;  %2156 = vmatmul.mubr.msk.bf16.vlgmr.msra.gmra.mxu0 %vm352_vm3, %v2546_v0  ;;  %v242_v40 = vshll.u32 %v2551_v1, 16  ;;  %v247_v41 = vshrl.u32 %v2556_v12, 16  ;;  %v225_v43 = vor.u32 %v224_v34, %v221_v27  ;;  %v250_v45 = vshll.u32 %v2556_v12, 16  ;;  %v2628_v34 = vld [vmem:[%s3396_s0 + $0x7c] sm:$0x1] }
  0x14   :  { %2192 = vmatpush3.bf16.msra.mxu0 %v2341_v51  ;;  %v212_v42 = vrot.slane %v211_v30, 4  ;;  %v235_v44 = vrot.slane %v233_v35, 4  ;;  %v238_v47 = vrot.slane %v236_v39, 5  ;;  %v256_v49 = vshll.u32 %v2575_v29, 16  ;;  %v2592_v51 = vld [vmem:[%s3396_s0 + $0x28] sm:$0xf] }
  0x15   :  { %2193 = vmatprep.subr.bf16.mxu0 %v2343_v15  ;;  %v249_v48 = vrot.slane %v247_v41, 4  ;;  %v226_v54 = vrot.slane %v225_v43, 4  ;;  %v252_v55 = vrot.slane %v250_v45, 5  ;;  %v156_v13 = vrot.slane %v155_v25, 4  ;;  %v2621_v25 = vld [vmem:[%s3396_s0 + $0x78] sm:$0xf] }
  0x16   :  { %v217_v53 = vsel %vm2486_vm2, %v212_v42, %v216_v31  ;;  %v239_v14 = vor.u32 %v238_v47, %v235_v44  ;;  %v258_v19 = vrot.slane %v256_v49, 5  ;;  %v163_v24 = vshrl.u32 %v2592_v51, 16 }
  0x17   :  { %v2614_v22 = vsel %vm2486_vm2, %v226_v54, %v230_v37  ;;  %v253_v23 = vor.u32 %v252_v55, %v249_v48  ;;  %v166_v27 = vshll.u32 %v2592_v51, 16  ;;  %v172_v31 = vshll.u32 %v2599_v60, 16  ;;  %v2634_v37 = vld [vmem:[%s3396_s0 + $0x30] sm:$0xf]  ;;  %v2650_v48 = vld [vmem:[%s3396_s0 + $0x34] sm:$0x1] }
  0x18   :  { %2194 = vmatpush3.bf16.msra.mxu0 %v2343_v15  ;;  %v244_v15 = vrot.slane %v242_v40, 5  ;;  %v240_v28 = vrot.slane %v239_v14, 4  ;;  %v1901_v30 = vcombine.low %v217_v53, %v2614_v22  ;;  %v261_v35 = vshrl.u32 %v2604_v61, 16 }
  0x19   :  { %2231 = vmatprep.subr.bf16.mxu0 %v2581_v36  ;;  %v254_v39 = vrot.slane %v253_v23, 4  ;;  %v165_v40 = vrot.slane %v163_v24, 4  ;;  %v168_v41 = vrot.slane %v166_v27, 5  ;;  %v264_v42 = vshll.u32 %v2604_v61, 16  ;;  %v2342_v23 = vld [vmem:[%s3397_s1] sm:$0xff]  }
  0x1a   :  { %v2639_v43 = vsel %vm2486_vm2, %v156_v13, %v160_v17  ;;  %v2643_v44 = vsel %vm2486_vm2, %v240_v28, %v244_v15  ;;  %2163 = vmatprep.mubr.msk.bf16.mxu1 %vm352_vm3, %v1901_v30  ;;  %v263_v45 = vrot.slane %v261_v35, 4  ;;  %v270_v47 = vshll.u32 %v2610_v20, 16  ;;  %v2673_v24 = vld [vmem:[%s3396_s0 + $0x3c] sm:$0x1]  ;;  %v2680_v35 = vld [vmem:[%s3396_s0 + $0x80] sm:$0xf] }
  0x1b   :  { %v2654_v17 = vsel %vm2486_vm2, %v254_v39, %v258_v19  ;;  %v169_v49 = vor.u32 %v168_v41, %v165_v40  ;;  %v174_v53 = vrot.slane %v172_v31, 5  ;;  %v266_v54 = vrot.slane %v264_v42, 5  ;;  %v2668_v19 = vld [vmem:[%s3396_s0 + $0x38] sm:$0xf] }
  0x1c   :  { %3416 = vst [vmem:[#allocation6_spill] sm:$0xff] %v2654_v17  ;;  %v2658_v55 = vcombine.low %v2643_v44, %v2654_v17  ;;  %v272_v13 = vrot.slane %v270_v47, 5  ;;  %v275_v14 = vshrl.u32 %v2621_v25, 16  ;;  %v278_v15 = vshll.u32 %v2621_v25, 16 }
  0x1d   :  { %v170_v27 = vrot.slane %v169_v49, 4  ;;  %v267_v28 = vor.u32 %v266_v54, %v263_v45  ;;  %v284_v30 = vshll.u32 %v2628_v34, 16  ;;  %v177_v31 = vshrl.u32 %v2634_v37, 16  ;;  %v2689_v45 = vld [vmem:[%s3396_s0 + $0x84] sm:$0x1] }
  0x1e   :  { %3417 = vst [vmem:[#allocation7_spill] sm:$0xff] %v2658_v55  ;;  %2164 = vmatmul.mubr.msk.bf16.vlgmr.msra.gmra.mxu1 %vm352_vm3, %v2658_v55  ;;  %v277_v39 = vrot.slane %v275_v14, 4  ;;  %v280_v40 = vrot.slane %v278_v15, 5  ;;  %v180_v41 = vshll.u32 %v2634_v37, 16  ;;  %v186_v42 = vshll.u32 %v2650_v48, 16  ;;  %v2699_v14 = vld [vmem:[%s3397_s1 + $0x38] sm:$0xff]  }
  0x1f   :  { %2172 = vmatpush3.bf16.msra.mxu1 %v2483_v32  ;;  %v2694_v47 = vsel %vm2486_vm2, %v170_v27, %v174_v53  ;;  %v268_v49 = vrot.slane %v267_v28, 4  ;;  %v286_v54 = vrot.slane %v284_v30, 5  ;;  %v179_v10 = vrot.slane %v177_v31, 4 }
  0x20   :  { %v2703_v15 = vcombine.low %v2639_v43, %v2694_v47  ;;  %v281_v9 = vor.u32 %v280_v40, %v277_v39  ;;  %2173 = vmatprep.subr.bf16.mxu1 %v2342_v23  ;;  %v182_v26 = vrot.slane %v180_v41, 5  ;;  %v188_v32 = vrot.slane %v186_v42, 5  ;;  %v2717_v39 = vld [vmem:[%s3396_s0 + $0x88] sm:$0xf] }
  0x21   :  { %v2707_v53 = vsel %vm2486_vm2, %v268_v49, %v272_v13  ;;  %v191_v27 = vshrl.u32 %v2668_v19, 16  ;;  %v194_v28 = vshll.u32 %v2668_v19, 16  ;;  %v200_v30 = vshll.u32 %v2673_v24, 16 }
  0x22   :  { %3418 = vst [vmem:[#allocation8_spill] sm:$0xff] %v2703_v15  ;;  %3419 = vst [vmem:[#allocation9_spill] sm:$0xff] %v2707_v53  ;;  %2159 = vmatprep.mubr.msk.bf16.mxu0 %vm352_vm3, %v2703_v15  ;;  %v282_v31 = vrot.slane %v281_v9, 4  ;;  %v183_v46 = vor.u32 %v182_v26, %v179_v10  ;;  %v289_v40 = vshrl.u32 %v2680_v35, 16  ;;  %v292_v13 = vshll.u32 %v2680_v35, 16 }
  0x23   :  { %v1936_v41 = vrot.slane %v2448_v7, 9  ;;  %v193_v42 = vrot.slane %v191_v27, 4  ;;  %v196_v49 = vrot.slane %v194_v28, 5  ;;  %v298_v9 = vshll.u32 %v2689_v45, 16  ;;  %2174 = vmatpush3.bf16.msra.mxu1 %v2342_v23 }
  0x24   :  { %v2730_v10 = vsel %vm2486_vm2, %v282_v31, %v286_v54  ;;  %v184_v26 = vrot.slane %v183_v46, 4  ;;  %v291_v18 = vrot.slane %v289_v40, 4  ;;  %v294_v55 = vrot.slane %v292_v13, 5  ;;  %2211 = vmatprep.subr.bf16.mxu1 %v2699_v14 }
  0x25   :  { %3420 = vst [vmem:[#allocation10_spill] sm:$0xff] %v2730_v10  ;;  %v2735_v27 = vcombine.low %v2707_v53, %v2730_v10  ;;  %v197_v28 = vor.u32 %v196_v49, %v193_v42  ;;  %v202_v15 = vrot.slane %v200_v30, 5  ;;  %v303_v0 = vshrl.u32 %v2717_v39, 16 }
  0x26   :  { %v2746_v46 = vsel %vm2486_vm2, %v184_v26, %v188_v32  ;;  %v295_v54 = vor.u32 %v294_v55, %v291_v18  ;;  %v306_v31 = vshll.u32 %v2717_v39, 16  ;;  %v312_v40 = vshll.u32 %v2725_v21, 16 }
  0x27   :  { %3421 = vst [vmem:[#allocation11_spill] sm:$0xff] %v2735_v27  ;;  %2167 = vmatprep.mubr.msk.bf16.mxu1 %vm352_vm3, %v2735_v27  ;;  %v198_v30 = vrot.slane %v197_v28, 4  ;;  %v305_v13 = vrot.slane %v303_v0, 4  ;;  %v1933_v42 = vrot.slane %v2423_v2, 9  ;;  %v1934_v49 = vrot.slane %v2433_v4, 9 }
  0x28   :  { %v680_v10 = vrot.slane %v2471_v16, 5  ;;  %v296_v17 = vrot.slane %v295_v54, 4  ;;  %v300_v53 = vrot.slane %v298_v9, 5  ;;  %v308_v32 = vrot.slane %v306_v31, 5 }
  0x29   :  { %v2757_v18 = vsel %vm2486_vm2, %v198_v30, %v202_v15  ;;  %v3424_v55 = vrot.slane %v2428_v3, 5  ;;  %v3425_v0 = vrot.slane %v2443_v6, 5  ;;  %v1937_v16 = vrot.slane %v2453_v8, 9 }
  0x2a   :  { %v2772_v9 = vcombine.low %v2746_v46, %v2757_v18  ;;  %v309_v54 = vor.u32 %v308_v32, %v305_v13  ;;  %v314_v15 = vrot.slane %v312_v40, 5  ;;  %v684_v3 = vrot.slane %v2494_v38, 5 }
  0x2b   :  { %v669_v26 = vsel %vm2740_vm6, %v1933_v42, %v3424_v55  ;;  %v2767_v28 = vsel %vm2740_vm6, %v1934_v49, %v3425_v0  ;;  %v1938_v30 = vrot.slane %v2592_v51, 9  ;;  %v688_v6 = vrot.slane %v2599_v60, 5 }
  0x2c   :  { %3426 = vst [vmem:[#allocation12_spill] sm:$0xff] %v2772_v9  ;;  %v1949_v31 = vcombine.low %v669_v26, %v2767_v28  ;;  %v3427_v42 = vrot.slane %v2462_v11, 5  ;;  %v3428_v49 = vrot.slane %v2438_v5, 9  ;;  %v2788_v13 = vsel %vm2740_vm6, %v1936_v41, %v680_v10  ;;  %2160 = vmatmul.mubr.msk.bf16.gmra.mxu0 %vm352_vm3, %v2772_v9 }
  0x2d   :  { %v2794_v38 = vsel %vm2486_vm2, %v296_v17, %v300_v53  ;;  %v310_v60 = vrot.slane %v309_v54, 4  ;;  %v2799_v11 = vsel %vm2740_vm6, %v1937_v16, %v684_v3  ;;  %v1915_v41 = vcombine.low %v2423_v2, %v2433_v4 }
  0x2e   :  { %v2784_v55 = vsel %vm2740_vm6, %v3428_v49, %v3427_v42  ;;  %2195 = vmatprep.mubr.msk.bf16.mxu0 %vm352_vm3, %v1949_v31  ;;  %v2809_v10 = vsel %vm2740_vm6, %v1938_v30, %v688_v6 }
  0x2f   :  { %v2803_v40 = vsel %vm2486_vm2, %v310_v60, %v314_v15 }
  0x30   :  { %7 = vsyncpa [#allocation3], 0  ;;  %v2815_v53 = vcombine.low %v2784_v55, %v2788_v13  ;;  %v2819_v32 = vcombine.low %v2794_v38, %v2803_v40  ;;  %v1939_v26 = vrot.slane %v2634_v37, 9  ;;  %v692_v2 = vrot.slane %v2650_v48, 5 }
  0x31   :  { %v1940_v0 = vrot.slane %v2668_v19, 9  ;;  %v696_v16 = vrot.slane %v2673_v24, 5  ;;  %v2829_v54 = vcombine.low %v2799_v11, %v2809_v10  ;;  %v700_v15 = vrot.slane %v2522_v57, 5  ;;  %v2353_v24 = vld [vmem:[%s3397_s1 + $0x40] sm:$0xff]  }
  0x32   :  { %3429 = vst [vmem:[#allocation13_spill] sm:$0xff] %v2819_v32  ;;  %2168 = vmatmul.mubr.msk.bf16.gmra.mxu1 %vm352_vm3, %v2819_v32  ;;  %v704_v31 = vrot.slane %v2537_v62, 5  ;;  %v1941_v3 = vrot.slane %v2517_v56, 9  ;;  %v1942_v48 = vrot.slane %v2527_v58, 9  ;;  %v2843_v30 = vsel %vm2740_vm6, %v1939_v26, %v692_v2  ;;  %v2878_v2 = vld [vmem:[%s3397_s1 + $0x68] sm:$0xff]  }
  0x33   :  { %3430 = vst [vmem:[#allocation14_spill] sm:$0xff] %v2829_v54  ;;  %2175 = vmatprep.mubr.msk.bf16.mxu1 %vm352_vm3, %v1915_v41  ;;  %v2847_v57 = vsel %vm2740_vm6, %v1940_v0, %v696_v16  ;;  %v2851_v62 = vcombine.low %v2438_v5, %v2448_v7  ;;  %v2858_v6 = vcombine.low %v2453_v8, %v2592_v51  ;;  %v708_v60 = vrot.slane %v2551_v1, 5  ;;  %v2351_v41 = vld [vmem:[%s3397_s1 + $0x30] sm:$0xff]  }
  0x34   :  { %2196 = vmatmul.mubr.msk.bf16.vlgmr.msra.gmra.mxu0 %vm352_vm3, %v2815_v53  ;;  %v701_v42 = vsel %vm2740_vm6, %v1941_v3, %v700_v15  ;;  %v2864_v49 = vsel %vm2740_vm6, %v1942_v48, %v704_v31  ;;  %v1943_v26 = vrot.slane %v2542_v63, 9  ;;  %v1944_v0 = vrot.slane %v2556_v12, 9 }
  0x35   :  { %2232 = vmatpush3.bf16.msra.mxu0 %v2581_v36  ;;  %2199 = vmatprep.mubr.msk.bf16.mxu0 %vm352_vm3, %v2829_v54  ;;  %v2869_v36 = vcombine.low %v2843_v30, %v2847_v57  ;;  %v712_v16 = vrot.slane %v2575_v29, 5  ;;  %v1953_v31 = vcombine.low %v701_v42, %v2864_v49  ;;  %v1945_v3 = vrot.slane %v2604_v61, 9 }
  0x36   :  { %2233 = vmatprep.subr.bf16.mxu0 %v2353_v24  ;;  %v716_v48 = vrot.slane %v2610_v20, 5  ;;  %v1946_v29 = vrot.slane %v2621_v25, 9  ;;  %v720_v15 = vrot.slane %v2628_v34, 5  ;;  %v2907_v20 = vld [vmem:[%s3396_s0 + $0x40] sm:$0xf]  ;;  %v2914_v34 = vcombine.low %v2634_v37, %v2668_v19 }
  0x37   :  { %3431 = vst [vmem:[#allocation15_spill] sm:$0xff] %v2869_v36  ;;  %v2003_v42 = vrot.slane %v2907_v20, 9  ;;  %v1919_v1 = vcombine.low %v2517_v56, %v2527_v58  ;;  %v2924_v32 = vsel %vm2740_vm6, %v1943_v26, %v708_v60  ;;  %v2928_v27 = vsel %vm2740_vm6, %v1944_v0, %v712_v16  ;;  %v2948_v26 = vld [vmem:[%s3396_s0 + $0x90] sm:$0xf] }
  0x38   :  { %v2932_v9 = vsel %vm2740_vm6, %v1945_v3, %v716_v48  ;;  %v1948_v56 = vrot.slane %v2717_v39, 9  ;;  %v2004_v16 = vrot.slane %v2948_v26, 9  ;;  %v1947_v48 = vrot.slane %v2680_v35, 9 }
  0x39   :  { %2234 = vmatpush3.bf16.msra.mxu0 %v2353_v24  ;;  %v2901_v24 = vld [vmem:[%s3397_s1 + $0x58] sm:$0xff]   ;;  %v2988_v54 = vcombine.low %v2542_v63, %v2556_v12  ;;  %v3016_v0 = vcombine.low %v2680_v35, %v2717_v39 }
  0x3a   :  { %2176 = vmatmul.mubr.msk.bf16.vlgmr.msra.gmra.mxu1 %vm352_vm3, %v2851_v62  ;;  %2271 = vmatprep.subr.bf16.mxu0 %v2878_v2 }
  0x3b   :  { %2212 = vmatpush3.bf16.msra.mxu1 %v2699_v14  ;;  %2179 = vmatprep.mubr.msk.bf16.mxu1 %vm352_vm3, %v2858_v6  ;;  %v30_v14 = vld [vmem:[%s3396_s0 + $0x44] sm:$0x1] }
  0x3c   :  { %2213 = vmatprep.subr.bf16.mxu1 %v2351_v41  ;;  %2200 = vmatmul.mubr.msk.bf16.gmra.mxu0 %vm352_vm3, %v2869_v36  ;;  %v1255_v17 = vrot.slane %v30_v14, 5  ;;  %v2936_v36 = vsel %vm2740_vm6, %v1946_v29, %v720_v15  ;;  %v724_v29 = vrot.slane %v2689_v45, 5 }
  0x3d   :  { %2203 = vmatprep.mubr.msk.bf16.mxu0 %vm352_vm3, %v1953_v31  ;;  %v728_v31 = vrot.slane %v2725_v21, 5  ;;  %v2969_v3 = vcombine.low %v2932_v9, %v2936_v36 }
  0x3e   :  { %v2942_v60 = vsel %vm2740_vm6, %v2003_v42, %v1255_v17  ;;  %v2961_v17 = vcombine.low %v2924_v32, %v2928_v27  ;;  %v2994_v45 = vsel %vm2740_vm6, %v1947_v48, %v724_v29 }
  0x3f   :  { %2214 = vmatpush3.bf16.msra.mxu1 %v2351_v41  ;;  %v2953_v41 = vld [vmem:[%s3396_s0 + $0x94] sm:$0x1]  ;;  %3433 = vst [vmem:[#allocation17_spill] sm:$0xff] %v2969_v3  ;;  %v2976_v42 = vsel %vm2740_vm6, %v1948_v56, %v728_v31  ;;  %v1068_v56 = vshll.u32 %v2907_v20, 16  ;;  %v3000_v31 = vcombine.low %v2604_v61, %v2621_v25 }
  0x40   :  { %2251 = vmatprep.subr.bf16.mxu1 %v2901_v24  ;;  %3432 = vst [vmem:[#allocation16_spill] sm:$0xff] %v2961_v17  ;;  %v1259_v15 = vrot.slane %v2953_v41, 5 }
  0x41   :  { %v1070_v29 = vrot.slane %v1068_v56, 5 }
  0x42   :  { %2180 = vmatmul.mubr.msk.bf16.gmra.mxu1 %vm352_vm3, %v2914_v34  ;;  %v2980_v21 = vsel %vm2740_vm6, %v2004_v16, %v1259_v15  ;;  %v3004_v16 = vcombine.low %v2994_v45, %v2976_v42  ;;  %v1985_v15 = vcombine.low %v2503_v50, %v2510_v52  ;;  %v1986_v50 = vcombine.low %v2531_v59, %v2639_v43 }
  0x43   :  { %2183 = vmatprep.mubr.msk.bf16.mxu1 %vm352_vm3, %v1919_v1  ;;  %v1065_v1 = vshrl.u32 %v2907_v20, 16  ;;  %v1987_v52 = vcombine.low %v2694_v47, %v2746_v46  ;;  %v1079_v43 = vshrl.u32 %v2948_v26, 16  ;;  %v2363_v47 = vld [vmem:[%s3397_s1 + $0x50] sm:$0xff]   ;;  %v2369_v46 = vld [vmem:[%s3397_s1 + $0x88] sm:$0xff]  }
  0x44   :  { %2204 = vmatmul.mubr.msk.bf16.gmra.mxu0 %vm352_vm3, %v2961_v17  ;;  %3434 = vst [vmem:[#allocation18_spill] sm:$0xff] %v3004_v16  ;;  %v1074_v17 = vshll.u32 %v30_v14, 16  ;;  %v2365_v14 = vld [vmem:[%s3397_s1 + $0x60] sm:$0xff]  }
  0x45   :  { %2207 = vmatprep.mubr.msk.bf16.mxu0 %vm352_vm3, %v2969_v3  ;;  %v1067_v48 = vrot.slane %v1065_v1, 4 }
  0x46   :  { %v1076_v56 = vrot.slane %v1074_v17, 5  ;;  %v1989_v17 = vcombine.low %v2614_v22, %v2643_v44  ;;  %v1088_v22 = vshll.u32 %v2953_v41, 16  ;;  %v3437_v44 = vld [vmem:[#allocation9_spill] sm:$0xff] }
  0x47   :  { %v1071_v3 = vor.u32 %v1070_v29, %v1067_v48 }
  0x49   :  { %v1072_v1 = vrot.slane %v1071_v3, 4  ;;  %v3436_v3 = vcombine.low %v2448_v7, %v2453_v8  ;;  %v1970_v7 = vcombine.low %v2668_v19, %v2907_v20  ;;  %v3440_v19 = vcombine.low %v2527_v58, %v2542_v63 }
  0x4a   :  { %2184 = vmatmul.mubr.msk.bf16.gmra.mxu1 %vm352_vm3, %v2988_v54  ;;  %v3442_v58 = vcombine.low %v2621_v25, %v2680_v35  ;;  %v1974_v63 = vcombine.low %v2717_v39, %v2948_v26  ;;  %v2007_v25 = vcombine.low %v2809_v10, %v2843_v30  ;;  %v2371_v35 = vld [vmem:[%s3397_s1 + $0x70] sm:$0xff]   ;;  %v3444_v10 = vcombine.low %v2847_v57, %v2942_v60 }
  0x4b   :  { %2187 = vmatprep.mubr.msk.bf16.mxu1 %vm352_vm3, %v3000_v31  ;;  %v3037_v59 = vsel %vm2486_vm2, %v1072_v1, %v1076_v56  ;;  %v3450_v56 = vld [vmem:[#allocation8_spill] sm:$0xff] }
  0x4c   :  { %2208 = vmatmul.mubr.msk.bf16.gmra.mxu0 %vm352_vm3, %v3004_v16  ;;  %v3435_v16 = vcombine.low %v2433_v4, %v2438_v5  ;;  %v1082_v4 = vshll.u32 %v2948_v26, 16  ;;  %v1969_v5 = vcombine.low %v2592_v51, %v2634_v37  ;;  %v1081_v51 = vrot.slane %v1079_v43, 4 }
  0x4d   :  { %2235 = vmatprep.mubr.msk.bf16.mxu0 %vm352_vm3, %v1985_v15  ;;  %v3439_v15 = vld [vmem:[#allocation10_spill] sm:$0xff] }
  0x4e   :  { %v1084_v37 = vrot.slane %v1082_v4, 5  ;;  %v1991_v48 = vcombine.low %v3439_v15, %v2794_v38  ;;  %v3441_v38 = vcombine.low %v2556_v12, %v2604_v61  ;;  %v2372_v12 = vld [vmem:[%s3397_s1 + $0x80] sm:$0xff]   ;;  %v31_v61 = vld [vmem:[%s3396_s0 + $0x48] sm:$0xf] }
  0x4f   :  { %v2023_v39 = vcombine.low %v2907_v20, %v31_v61  ;;  %v1558_v30 = vshrl.u32 %v31_v61, 16  ;;  %v1561_v57 = vshll.u32 %v31_v61, 16  ;;  %v3447_v20 = vld [vmem:[#allocation5_spill] sm:$0xff]  ;;  %v3451_v4 = vld [vmem:[#allocation12_spill] sm:$0xff]  ;;  %v3456_v15 = vld [vmem:[#allocation11_spill] sm:$0xff] }
  0x50   :  { %v1085_v8 = vor.u32 %v1084_v37, %v1081_v51  ;;  %v3453_v37 = vld [vmem:[#allocation7_spill] sm:$0xff] }
  0x52   :  { %2188 = vmatmul.mubr.msk.bf16.gmra.mxu1 %vm352_vm3, %v3016_v0  ;;  %v1086_v29 = vrot.slane %v1085_v8, 4  ;;  %v3454_v8 = vld [vmem:[#allocation17_spill] sm:$0xff] }
  0x53   :  { %2215 = vmatprep.mubr.msk.bf16.mxu1 %vm352_vm3, %v3435_v16 }
  0x54   :  { %2236 = vmatmul.mubr.msk.bf16.vlgmr.msra.gmra.mxu0 %vm352_vm3, %v1986_v50  ;;  %v1090_v50 = vrot.slane %v1088_v22, 5 }
  0x55   :  { %2272 = vmatpush3.bf16.msra.mxu0 %v2878_v2  ;;  %2239 = vmatprep.mubr.msk.bf16.mxu0 %vm352_vm3, %v1987_v52  ;;  %v1988_v2 = vcombine.low %v2757_v18, %v3037_v59  ;;  %v2368_v18 = vld [vmem:[%s3397_s1 + $0x78] sm:$0xff]  }
  0x56   :  { %2273 = vmatprep.subr.bf16.mxu0 %v2365_v14  ;;  %v3080_v41 = vsel %vm2486_vm2, %v1086_v29, %v1090_v50 }
  0x57   :  { %v1992_v52 = vcombine.low %v2803_v40, %v3080_v41  ;;  %v2005_v40 = vcombine.low %v2767_v28, %v2784_v55  ;;  %v3443_v28 = vcombine.low %v2788_v13, %v2799_v11  ;;  %v2009_v55 = vcombine.low %v2864_v49, %v2924_v32  ;;  %v51_v13 = vld [vmem:[%s3396_s0 + $0x98] sm:$0xf]  ;;  %v32_v49 = vld [vmem:[%s3396_s0 + $0x4c] sm:$0x1] }
  0x58   :  { %v2011_v11 = vcombine.low %v2936_v36, %v2994_v45  ;;  %v2024_v32 = vcombine.low %v2948_v26, %v51_v13  ;;  %v1724_v36 = vrot.slane %v32_v49, 5  ;;  %v1567_v26 = vshll.u32 %v32_v49, 16 }
  0x59   :  { %2274 = vmatpush3.bf16.msra.mxu0 %v2365_v14  ;;  %v1572_v14 = vshrl.u32 %v51_v13, 16  ;;  %v1575_v43 = vshll.u32 %v51_v13, 16 }
  0x5a   :  { %2216 = vmatmul.mubr.msk.bf16.vlgmr.msra.gmra.mxu1 %vm352_vm3, %v3436_v3  ;;  %2311 = vmatprep.subr.bf16.mxu0 %v2369_v46  ;;  %v2048_v3 = vrot.slane %v51_v13, 9 }
  0x5b   :  { %2252 = vmatpush3.bf16.msra.mxu1 %v2901_v24  ;;  %2219 = vmatprep.mubr.msk.bf16.mxu1 %vm352_vm3, %v1969_v5  ;;  %v3438_v24 = vld [vmem:[#allocation6_spill] sm:$0xff] }
  0x5c   :  { %2253 = vmatprep.subr.bf16.mxu1 %v2363_v47  ;;  %2240 = vmatmul.mubr.msk.bf16.gmra.mxu0 %vm352_vm3, %v1988_v2  ;;  %v1990_v16 = vcombine.low %v3438_v24, %v3437_v44  ;;  %v1574_v2 = vrot.slane %v1572_v14, 4 }
  0x5d   :  { %2243 = vmatprep.mubr.msk.bf16.mxu0 %vm352_vm3, %v1989_v17  ;;  %v52_v17 = vld [vmem:[%s3396_s0 + $0x9c] sm:$0x1]  ;;  %s2396_s0 = smov [#allocation2]  }
  0x5e   :  { %v1728_v51 = vrot.slane %v52_v17, 5  ;;  %s1886_s12 = sshll.u32 %s2396_s0, 4  ;;  %s1887_s12 = int_to_ptr.vmem [resolvable:$true] %s1886_s12 }
  0x5f   :  { %2254 = vmatpush3.bf16.msra.mxu1 %v2363_v47  ;;  %s2374_s13 = scalar_lea.vmem %s1887_s12, 2048  ;;  %p2379_p1 = scmp.lt.s32.totalorder %s1887_s12, %s1887_s12 }
  0x60   :  { %2291 = vmatprep.subr.bf16.mxu1 %v2368_v18  ;;  %v1729_v22 = vsel %vm2740_vm6, %v2048_v3, %v1728_v51  ;;  %p2375_p0 = scmp.ne.s32.totalorder %s1887_s12, %s2374_s13  ;;  %p2380_p2 = scmp.lt.s32.totalorder %s2374_s13, %s2374_s13 }
  0x62   :  { %2220 = vmatmul.mubr.msk.bf16.gmra.mxu1 %vm352_vm3, %v1970_v7  ;;  %v1581_v7 = vshll.u32 %v52_v17, 16  ;;  %p2381_p3 = por %p2380_p2, %p2379_p1 }
  0x63   :  { %2223 = vmatprep.mubr.msk.bf16.mxu1 %vm352_vm3, %v3440_v19 }
  0x64   :  { %2244 = vmatmul.mubr.msk.bf16.gmra.mxu0 %vm352_vm3, %v1990_v16  ;;  %v1583_v24 = vrot.slane %v1581_v7, 5  ;;  %v2050_v16 = vcombine.low %v2980_v21, %v1729_v22  ;;  %p2382_p4 = pnand %p2381_p3, %p2375_p0 }
  0x65   :  { %2247 = vmatprep.mubr.msk.bf16.mxu0 %vm352_vm3, %v1991_v48  ;;  %v3457_v48 = vld [vmem:[#allocation13_spill] sm:$0xff] }
  0x6a   :  { %2224 = vmatmul.mubr.msk.bf16.gmra.mxu1 %vm352_vm3, %v3441_v38 }
  0x6b   :  { %2227 = vmatprep.mubr.msk.bf16.mxu1 %vm352_vm3, %v3442_v58 }
  0x6c   :  { %2248 = vmatmul.mubr.msk.bf16.gmra.mxu0 %vm352_vm3, %v1992_v52 }
  0x6d   :  { %2275 = vmatprep.mubr.msk.bf16.mxu0 %vm352_vm3, %v2851_v62  ;;  %v1560_v62 = vrot.slane %v1558_v30, 4 }
  0x72   :  { %2228 = vmatmul.mubr.msk.bf16.gmra.mxu1 %vm352_vm3, %v1974_v63 }
  0x73   :  { %2255 = vmatprep.mubr.msk.bf16.mxu1 %vm352_vm3, %v2005_v40 }
  0x74   :  { %2276 = vmatmul.mubr.msk.bf16.vlgmr.msra.gmra.mxu0 %vm352_vm3, %v2858_v6  ;;  %v1563_v6 = vrot.slane %v1561_v57, 5 }
  0x75   :  { %2312 = vmatpush3.bf16.msra.mxu0 %v2369_v46  ;;  %2279 = vmatprep.mubr.msk.bf16.mxu0 %vm352_vm3, %v2914_v34  ;;  %v3452_v46 = vld [vmem:[#allocation16_spill] sm:$0xff] }
  0x76   :  { %2313 = vmatprep.subr.bf16.mxu0 %v2372_v12  ;;  %v1564_v34 = vor.u32 %v1563_v6, %v1560_v62 }
  0x79   :  { %2314 = vmatpush3.bf16.msra.mxu0 %v2372_v12 }
  0x7a   :  { %2256 = vmatmul.mubr.msk.bf16.vlgmr.msra.gmra.mxu1 %vm352_vm3, %v3443_v28 }
  0x7b   :  { %2292 = vmatpush3.bf16.msra.mxu1 %v2368_v18  ;;  %2259 = vmatprep.mubr.msk.bf16.mxu1 %vm352_vm3, %v2007_v25 }
  0x7c   :  { %2293 = vmatprep.subr.bf16.mxu1 %v2371_v35  ;;  %2280 = vmatmul.mubr.msk.bf16.gmra.mxu0 %vm352_vm3, %v2023_v39 }
  0x7d   :  { %2283 = vmatprep.mubr.msk.bf16.mxu0 %vm352_vm3, %v2988_v54  ;;  %v3445_v54 = vcombine.low %v2928_v27, %v2932_v9  ;;  %v3446_v27 = vcombine.low %v2976_v42, %v2980_v21  ;;  %v2047_v9 = vrot.slane %v31_v61, 9  ;;  %v1569_v42 = vrot.slane %v1567_v26, 5 }
  0x7f   :  { %2294 = vmatpush3.bf16.msra.mxu1 %v2371_v35  ;;  %v1725_v45 = vsel %vm2740_vm6, %v2047_v9, %v1724_v36 }
  0x80   :  { %v2049_v1 = vcombine.low %v2942_v60, %v1725_v45  ;;  %v1577_v60 = vrot.slane %v1575_v43, 5 }
  0x82   :  { %2260 = vmatmul.mubr.msk.bf16.gmra.mxu1 %vm352_vm3, %v3444_v10  ;;  %v1578_v18 = vor.u32 %v1577_v60, %v1574_v2 }
  0x83   :  { %2263 = vmatprep.mubr.msk.bf16.mxu1 %vm352_vm3, %v2009_v55 }
  0x84   :  { %2284 = vmatmul.mubr.msk.bf16.gmra.mxu0 %vm352_vm3, %v3000_v31  ;;  %v1565_v31 = vrot.slane %v1564_v34, 4  ;;  %v1579_v44 = vrot.slane %v1578_v18, 4 }
  0x85   :  { %2287 = vmatprep.mubr.msk.bf16.mxu0 %vm352_vm3, %v3016_v0  ;;  %v3448_v0 = vld [vmem:[#allocation14_spill] sm:$0xff] }
  0x86   :  { %v1570_v5 = vsel %vm2486_vm2, %v1565_v31, %v1569_v42  ;;  %v1584_v29 = vsel %vm2486_vm2, %v1579_v44, %v1583_v24 }
  0x87   :  { %v2035_v47 = vcombine.low %v3037_v59, %v1570_v5  ;;  %v3455_v59 = vld [vmem:[#allocation18_spill] sm:$0xff]  ;;  %v2036_v50 = vcombine.low %v3080_v41, %v1584_v29 }
  0x8a   :  { %2264 = vmatmul.mubr.msk.bf16.gmra.mxu1 %vm352_vm3, %v3445_v54 }
  0x8b   :  { %2267 = vmatprep.mubr.msk.bf16.mxu1 %vm352_vm3, %v2011_v11 }
  0x8c   :  { %2288 = vmatmul.mubr.msk.bf16.gmra.mxu0 %vm352_vm3, %v2024_v32 }
  0x8d   :  { %2315 = vmatprep.mubr.msk.bf16.mxu0 %vm352_vm3, %v2815_v53  ;;  %v3449_v53 = vld [vmem:[#allocation15_spill] sm:$0xff] }
  0x92   :  { %2268 = vmatmul.mubr.msk.bf16.gmra.mxu1 %vm352_vm3, %v3446_v27 }
  0x93   :  { %2295 = vmatprep.mubr.msk.bf16.mxu1 %vm352_vm3, %v3447_v20 }
  0x94   :  { %2316 = vmatmul.mubr.msk.bf16.vlgmr.msra.gmra.mxu0 %vm352_vm3, %v3448_v0 }
  0x95   :  { %2319 = vmatprep.mubr.msk.bf16.mxu0 %vm352_vm3, %v3449_v53 }
  0x9a   :  { %2296 = vmatmul.mubr.msk.bf16.vlgmr.msra.gmra.mxu1 %vm352_vm3, %v3450_v56 }
  0x9b   :  { %2299 = vmatprep.mubr.msk.bf16.mxu1 %vm352_vm3, %v3451_v4 }
  0x9c   :  { %2320 = vmatmul.mubr.msk.bf16.gmra.mxu0 %vm352_vm3, %v2049_v1 }
  0x9d   :  { %2323 = vmatprep.mubr.msk.bf16.mxu0 %vm352_vm3, %v3452_v46 }
  0xa2   :  { %2300 = vmatmul.mubr.msk.bf16.gmra.mxu1 %vm352_vm3, %v2035_v47 }
  0xa3   :  { %2303 = vmatprep.mubr.msk.bf16.mxu1 %vm352_vm3, %v3453_v37 }
  0xa4   :  { %2324 = vmatmul.mubr.msk.bf16.gmra.mxu0 %vm352_vm3, %v3454_v8 }
  0xa5   :  { %2327 = vmatprep.mubr.msk.bf16.mxu0 %vm352_vm3, %v3455_v59 }
  0xaa   :  { %2304 = vmatmul.mubr.msk.bf16.gmra.mxu1 %vm352_vm3, %v3456_v15 }
  0xab   :  { %2307 = vmatprep.mubr.msk.bf16.mxu1 %vm352_vm3, %v3457_v48 }
  0xac   :  { %2328 = vmatmul.mubr.msk.bf16.gmra.mxu0 %vm352_vm3, %v2050_v16 }
  0xb2   :  { %2308 = vmatmul.mubr.msk.bf16.gmra.mxu1 %vm352_vm3, %v2036_v50 }
  0xd3   :  { %v2157_v23 = vpop.f32.mrf.mxu0 }
  0xd5   :  { %v411_v19 = vpop.f32.mrf.mxu0 }
  0xd7   :  { %v2158_v38 = vpop.f32.mrf.mxu0 }
  0xd9   :  { %v414_v58 = vpop.f32.mrf.mxu0 }
  0xde   :  { %v2165_v52 = vpop.f32.mrf.mxu1 }
  0xe0   :  { %v443_v21 = vpop.f32.mrf.mxu1 }
  0xe2   :  { %v2166_v63 = vpop.f32.mrf.mxu1 }
  0xe4   :  { %v446_v12 = vpop.f32.mrf.mxu1 }
  0xec   :  { %v2161_v40 = vpop.f32.mrf.mxu0 }
  0xee   :  { %v427_v61 = vpop.f32.mrf.mxu0 }
  0xf0   :  { %v2162_v25 = vpop.f32.mrf.mxu0 }
  0xf2   :  { %v2169_v35 = vpop.f32.mrf.mxu1  ;;  %v430_v33 = vpop.f32.mrf.mxu0 }
  0xf4   :  { %v459_v39 = vpop.f32.mrf.mxu1  ;;  %v2197_v28 = vpop.f32.mrf.mxu0 }
  0xf6   :  { %v2170_v55 = vpop.f32.mrf.mxu1  ;;  %v824_v10 = vpop.f32.mrf.mxu0 }
  0xf8   :  { %v3198_v41 = vpop.f32.mrf.mxu1  ;;  %v2198_v13 = vpop.f32.mrf.mxu0 }
  0xfa   :  { %v2177_v11 = vpop.f32.mrf.mxu1  ;;  %v827_v54 = vpop.f32.mrf.mxu0 }
  0xfb   :  { %v593_v32 = vadd.f32 %v2177_v11, %v2157_v23 }
  0xfc   :  { %v584_v30 = vpop.f32.mrf.mxu1  ;;  %v2201_v6 = vpop.f32.mrf.mxu0 }
  0xfd   :  { %v3200_v57 = vadd.f32 %v2197_v28, %v593_v32  ;;  %v585_v62 = vadd.f32 %v584_v30, %v411_v19 }
  0xfe   :  { %v2178_v49 = vpop.f32.mrf.mxu1  ;;  %v840_v36 = vpop.f32.mrf.mxu0 }
  0xff   :  { %v3202_v27 = vadd.f32 %v824_v10, %v585_v62  ;;  %v596_v9 = vadd.f32 %v2178_v49, %v2158_v38 }
 0x100   :  { %v587_v20 = vpop.f32.mrf.mxu1  ;;  %v2202_v0 = vpop.f32.mrf.mxu0 }
 0x101   :  { %v3204_v34 = vadd.f32 %v2198_v13, %v596_v9  ;;  %v588_v26 = vadd.f32 %v587_v20, %v414_v58 }
 0x102   :  { %v2181_v53 = vpop.f32.mrf.mxu1  ;;  %v843_v42 = vpop.f32.mrf.mxu0 }
 0x103   :  { %v3206_v45 = vadd.f32 %v827_v54, %v588_v26  ;;  %v609_v31 = vadd.f32 %v2181_v53, %v2161_v40 }
 0x104   :  { %v600_v1 = vpop.f32.mrf.mxu1  ;;  %v2205_v43 = vpop.f32.mrf.mxu0 }
 0x105   :  { %v3208_v56 = vadd.f32 %v2201_v6, %v609_v31  ;;  %v601_v14 = vadd.f32 %v600_v1, %v427_v61 }
 0x106   :  { %v2182_v4 = vpop.f32.mrf.mxu1  ;;  %v856_v46 = vpop.f32.mrf.mxu0 }
 0x107   :  { %v3210_v5 = vadd.f32 %v840_v36, %v601_v14  ;;  %v612_v47 = vadd.f32 %v2182_v4, %v2162_v25 }
 0x108   :  { %v603_v2 = vpop.f32.mrf.mxu1  ;;  %v2206_v3 = vpop.f32.mrf.mxu0 }
 0x109   :  { %v3212_v60 = vadd.f32 %v2202_v0, %v612_v47  ;;  %v604_v17 = vadd.f32 %v603_v2, %v430_v33 }
 0x10a   :  { %v2185_v51 = vpop.f32.mrf.mxu1  ;;  %v859_v7 = vpop.f32.mrf.mxu0 }
 0x10b   :  { %v3214_v37 = vadd.f32 %v843_v42, %v604_v17  ;;  %v625_v18 = vadd.f32 %v2185_v51, %v2165_v52 }
 0x10c   :  { %v616_v8 = vpop.f32.mrf.mxu1  ;;  %v2209_v44 = vpop.f32.mrf.mxu0 }
 0x10d   :  { %v3216_v59 = vadd.f32 %v2205_v43, %v625_v18  ;;  %v617_v22 = vadd.f32 %v616_v8, %v443_v21 }
 0x10e   :  { %v2186_v24 = vpop.f32.mrf.mxu1  ;;  %v872_v48 = vpop.f32.mrf.mxu0 }
 0x10f   :  { %v3218_v16 = vadd.f32 %v856_v46, %v617_v22  ;;  %v628_v15 = vadd.f32 %v2186_v24, %v2166_v63 }
 0x110   :  { %v619_v29 = vpop.f32.mrf.mxu1  ;;  %v2210_v19 = vpop.f32.mrf.mxu0 }
 0x111   :  { %v3220_v50 = vadd.f32 %v2206_v3, %v628_v15  ;;  %v620_v23 = vadd.f32 %v619_v29, %v446_v12 }
 0x112   :  { %v2189_v38 = vpop.f32.mrf.mxu1  ;;  %v875_v40 = vpop.f32.mrf.mxu0 }
 0x113   :  { %v3222_v58 = vadd.f32 %v859_v7, %v620_v23  ;;  %v641_v52 = vadd.f32 %v2189_v38, %v2169_v35 }
 0x114   :  { %v632_v61 = vpop.f32.mrf.mxu1  ;;  %v3226_v33 = vpop.f32.mrf.mxu0 }
 0x115   :  { %v3224_v25 = vadd.f32 %v2209_v44, %v641_v52  ;;  %v633_v21 = vadd.f32 %v632_v61, %v459_v39 }
 0x116   :  { %v2190_v28 = vpop.f32.mrf.mxu1  ;;  %v3230_v13 = vpop.f32.mrf.mxu0 }
 0x117   :  { %v3228_v10 = vadd.f32 %v872_v48, %v633_v21  ;;  %v644_v63 = vadd.f32 %v2190_v28, %v2170_v55 }
 0x118   :  { %v635_v11 = vpop.f32.mrf.mxu1  ;;  %v3235_v54 = vpop.f32.mrf.mxu0 }
 0x119   :  { %3458 = vst [vmem:[#allocation9_spill] sm:$0xff] %v3228_v10  ;;  %v3232_v12 = vadd.f32 %v2210_v19, %v644_v63  ;;  %v636_v32 = vadd.f32 %v635_v11, %v3198_v41 }
 0x11a   :  { %v2217_v35 = vpop.f32.mrf.mxu1  ;;  %v3239_v62 = vpop.f32.mrf.mxu0 }
 0x11b   :  { %3459 = vst [vmem:[#allocation6_spill] sm:$0xff] %v3232_v12  ;;  %v3237_v30 = vadd.f32 %v875_v40, %v636_v32 }
 0x11c   :  { %v985_v39 = vpop.f32.mrf.mxu1  ;;  %v3241_v6 = vpop.f32.mrf.mxu0 }
 0x11d   :  { %3460 = vst [vmem:[#allocation10_spill] sm:$0xff] %v3237_v30 }
 0x11e   :  { %v2218_v49 = vpop.f32.mrf.mxu1  ;;  %v3243_v9 = vpop.f32.mrf.mxu0 }
 0x120   :  { %v988_v55 = vpop.f32.mrf.mxu1  ;;  %v3245_v36 = vpop.f32.mrf.mxu0 }
 0x122   :  { %v2221_v20 = vpop.f32.mrf.mxu1  ;;  %v3247_v26 = vpop.f32.mrf.mxu0 }
 0x124   :  { %v1001_v41 = vpop.f32.mrf.mxu1  ;;  %v3249_v0 = vpop.f32.mrf.mxu0 }
 0x126   :  { %v3251_v53 = vpop.f32.mrf.mxu1  ;;  %v3253_v31 = vpop.f32.mrf.mxu0 }
 0x128   :  { %v3255_v42 = vpop.f32.mrf.mxu1  ;;  %v3257_v1 = vpop.f32.mrf.mxu0 }
 0x12a   :  { %v3259_v14 = vpop.f32.mrf.mxu1  ;;  %v3261_v43 = vpop.f32.mrf.mxu0 }
 0x12b   :  { %3461 = vst [vmem:[#allocation5_spill] sm:$0xff] %v3261_v43 }
 0x12c   :  { %v3263_v4 = vpop.f32.mrf.mxu1  ;;  %v3265_v47 = vpop.f32.mrf.mxu0 }
 0x12d   :  { %3462 = vst [vmem:[#allocation14_spill] sm:$0xff] %v3265_v47 }
 0x12e   :  { %v3267_v46 = vpop.f32.mrf.mxu1  ;;  %v3269_v2 = vpop.f32.mrf.mxu0 }
 0x12f   :  { %3463 = vst [vmem:[#allocation15_spill] sm:$0xff] %v3269_v2 }
 0x130   :  { %v3271_v17 = vpop.f32.mrf.mxu1  ;;  %v3273_v3 = vpop.f32.mrf.mxu0 }
 0x131   :  { %3464 = vst [vmem:[#allocation8_spill] sm:$0xff] %v3273_v3 }
 0x132   :  { %v3275_v51 = vpop.f32.mrf.mxu1  ;;  %v3277_v18 = vpop.f32.mrf.mxu0 }
 0x133   :  { %3465 = vst [vmem:[#allocation12_spill] sm:$0xff] %v3277_v18 }
 0x134   :  { %v3279_v7 = vpop.f32.mrf.mxu1  ;;  %v2277_v8 = vpop.f32.mrf.mxu0 }
 0x135   :  { %3466 = vst [vmem:[#allocation16_spill] sm:$0xff] %v3279_v7  ;;  %v1050_v7 = vadd.f32 %v2217_v35, %v3200_v57  ;;  %v1049_v35 = vadd.f32 %v988_v55, %v3206_v45  ;;  %v1055_v45 = vadd.f32 %v3251_v53, %v3212_v60 }
 0x136   :  { %v3281_v22 = vpop.f32.mrf.mxu1  ;;  %v1478_v44 = vpop.f32.mrf.mxu0 }
 0x137   :  { %3467 = vst [vmem:[#allocation7_spill] sm:$0xff] %v3281_v22  ;;  %v1242_v60 = vadd.f32 %v3245_v36, %v1055_v45 }
 0x138   :  { %v3283_v24 = vpop.f32.mrf.mxu1  ;;  %v2278_v15 = vpop.f32.mrf.mxu0 }
 0x139   :  { %3468 = vst [vmem:[#allocation17_spill] sm:$0xff] %v3283_v24 }
 0x13a   :  { %v2257_v48 = vpop.f32.mrf.mxu1  ;;  %v3285_v29 = vpop.f32.mrf.mxu0 }
 0x13c   :  { %v1341_v23 = vpop.f32.mrf.mxu1  ;;  %v3287_v19 = vpop.f32.mrf.mxu0 }
 0x13e   :  { %v2258_v38 = vpop.f32.mrf.mxu1  ;;  %v3289_v52 = vpop.f32.mrf.mxu0 }
 0x140   :  { %v1344_v40 = vpop.f32.mrf.mxu1  ;;  %v3291_v61 = vpop.f32.mrf.mxu0 }
 0x142   :  { %v2261_v21 = vpop.f32.mrf.mxu1  ;;  %v3293_v28 = vpop.f32.mrf.mxu0 }
 0x143   :  { %3469 = vst [vmem:[#allocation18_spill] sm:$0xff] %v3293_v28 }
 0x144   :  { %v1357_v63 = vpop.f32.mrf.mxu1  ;;  %v3295_v11 = vpop.f32.mrf.mxu0 }
 0x145   :  { %3470 = vst [vmem:[#allocation11_spill] sm:$0xff] %v3295_v11 }
 0x146   :  { %v2262_v32 = vpop.f32.mrf.mxu1  ;;  %v3297_v18 = vpop.f32.mrf.mxu0 }
 0x147   :  { %3471 = vst [vmem:[#allocation13_spill] sm:$0xff] %v3297_v18  ;;  %v1048_v18 = vadd.f32 %v985_v39, %v3202_v27  ;;  %v1054_v39 = vadd.f32 %v2221_v20, %v3208_v56  ;;  %v1411_v36 = vadd.f32 %v2262_v32, %v1242_v60  ;;  %v1057_v32 = vadd.f32 %v3271_v17, %v3222_v58 }
 0x148   :  { %v3299_v3 = vpop.f32.mrf.mxu1  ;;  %v3301_v24 = vpop.f32.mrf.mxu0 }
 0x149   :  { %3472 = vst [vmem:[#allocation19_spill] sm:$0xff] %v3301_v24  ;;  %v1235_v57 = vadd.f32 %v3230_v13, %v1048_v18 }
 0x14a   :  { %v3303_v30 = vpop.f32.mrf.mxu1  ;;  %v3305_v2 = vpop.f32.mrf.mxu0 }
 0x14b   :  { %3473 = vst [vmem:[#allocation20_spill] sm:$0xff] %v3305_v2  ;;  %v1237_v2 = vadd.f32 %v3226_v33, %v1050_v7  ;;  %v1236_v7 = vadd.f32 %v3239_v62, %v1049_v35 }
 0x14c   :  { %v3307_v22 = vpop.f32.mrf.mxu1  ;;  %v3309_v12 = vpop.f32.mrf.mxu0 }
 0x14d   :  { %3474 = vst [vmem:[#allocation21_spill] sm:$0xff] %v3307_v22  ;;  %3475 = vst [vmem:[#allocation22_spill] sm:$0xff] %v3309_v12  ;;  %v1051_v22 = vadd.f32 %v2218_v49, %v3204_v34  ;;  %v1052_v34 = vadd.f32 %v1001_v41, %v3210_v5  ;;  %v1053_v5 = vadd.f32 %v3255_v42, %v3214_v37 }
 0x14e   :  { %v3311_v47 = vpop.f32.mrf.mxu1  ;;  %v3314_v11 = vpop.f32.mrf.mxu0 }
 0x14f   :  { %3476 = vst [vmem:[#allocation23_spill] sm:$0xff] %v3311_v47  ;;  %3477 = vst [vmem:[#allocation24_spill] sm:$0xff] %v3314_v11  ;;  %v1406_v11 = vadd.f32 %v2257_v48, %v1237_v2  ;;  %v1238_v27 = vadd.f32 %v3235_v54, %v1051_v22  ;;  %v1241_v2 = vadd.f32 %v3241_v6, %v1054_v39 }
 0x150   :  { %v3316_v10 = vpop.f32.mrf.mxu1  ;;  %v3319_v43 = vpop.f32.mrf.mxu0  ;;  %v1405_v22 = vadd.f32 %v1344_v40, %v1236_v7  ;;  %v1239_v48 = vadd.f32 %v3243_v9, %v1052_v34  ;;  %v1058_v6 = vadd.f32 %v3259_v14, %v3216_v59  ;;  %v1240_v37 = vadd.f32 %v3247_v26, %v1053_v5 }
 0x151   :  { %3478 = vst [vmem:[#allocation25_spill] sm:$0xff] %v3316_v10  ;;  %3479 = vst [vmem:[#allocation26_spill] sm:$0xff] %v3319_v43  ;;  %v1404_v43 = vadd.f32 %v1341_v23, %v1235_v57  ;;  %v1407_v13 = vadd.f32 %v2258_v38, %v1238_v27  ;;  %v1062_v34 = vadd.f32 %v3275_v51, %v3224_v25 }
 0x152   :  { %v3321_v24 = vpop.f32.mrf.mxu1  ;;  %v3325_v28 = vpop.f32.mrf.mxu0  ;;  %v1409_v26 = vadd.f32 %v3299_v3, %v1240_v37  ;;  %v3493_v37 = vld [vmem:[#allocation15_spill] sm:$0xff] }
 0x153   :  { %3480 = vst [vmem:[#allocation27_spill] sm:$0xff] %v3325_v28  ;;  %v1543_v28 = vadd.f32 %v2277_v8, %v1406_v11  ;;  %v1541_v54 = vadd.f32 %v1478_v44, %v1404_v43  ;;  %v1544_v62 = vadd.f32 %v2278_v15, %v1407_v13  ;;  %v1410_v8 = vadd.f32 %v2261_v21, %v1241_v2  ;;  %v3481_v13 = vld [vmem:[#allocation18_spill] sm:$0xff]  ;;  %v3484_v2 = vld [vmem:[#allocation9_spill] sm:$0xff] }
 0x154   :  { %v3327_v12 = vpop.f32.mrf.mxu1  ;;  %v2317_v10 = vpop.f32.mrf.mxu0  ;;  %v1542_v43 = vadd.f32 %v3285_v29, %v1405_v22  ;;  %v1408_v44 = vadd.f32 %v1357_v63, %v1239_v48  ;;  %v1245_v29 = vadd.f32 %v3249_v0, %v1058_v6  ;;  %v1059_v63 = vadd.f32 %v3267_v46, %v3220_v50  ;;  %v3491_v6 = vld [vmem:[#allocation13_spill] sm:$0xff] }
 0x155   :  { %v1547_v15 = vadd.f32 %v3287_v19, %v1410_v8  ;;  %v1548_v0 = vadd.f32 %v3291_v61, %v1411_v36 }
 0x156   :  { %v3331_v47 = vpop.f32.mrf.mxu1  ;;  %v1786_v33 = vpop.f32.mrf.mxu0  ;;  %v1545_v35 = vadd.f32 %v3289_v52, %v1408_v44  ;;  %v1246_v3 = vadd.f32 %v3257_v1, %v1059_v63  ;;  %v3487_v48 = vld [vmem:[#allocation23_spill] sm:$0xff] }
 0x158   :  { %v3336_v49 = vpop.f32.mrf.mxu1  ;;  %v2318_v18 = vpop.f32.mrf.mxu0  ;;  %v1415_v5 = vadd.f32 %v3487_v48, %v1246_v3  ;;  %v3500_v3 = vld [vmem:[#allocation22_spill] sm:$0xff] }
 0x15a   :  { %v2297_v55 = vpop.f32.mrf.mxu1  ;;  %v1789_v20 = vpop.f32.mrf.mxu0 }
 0x15b   :  { %v1706_v56 = vadd.f32 %v2297_v55, %v1543_v28  ;;  %v3483_v55 = vld [vmem:[#allocation5_spill] sm:$0xff] }
 0x15c   :  { %v1641_v41 = vpop.f32.mrf.mxu1  ;;  %v2321_v11 = vpop.f32.mrf.mxu0 }
 0x15d   :  { %v1851_v23 = vadd.f32 %v2317_v10, %v1706_v56  ;;  %v1704_v38 = vadd.f32 %v1641_v41, %v1541_v54  ;;  %v1056_v10 = vadd.f32 %v3263_v4, %v3218_v16  ;;  %v3485_v54 = vld [vmem:[#allocation16_spill] sm:$0xff] }
 0x15e   :  { %v2298_v53 = vpop.f32.mrf.mxu1  ;;  %v1802_v28 = vpop.f32.mrf.mxu0  ;;  %v1060_v22 = vadd.f32 %v3485_v54, %v3484_v2 }
 0x15f   :  { %1867 = vst [vmem:[#allocation2 + $0x10] sm:$0xff] %v1851_v23  ;;  %v1849_v9 = vadd.f32 %v1786_v33, %v1704_v38  ;;  %v1707_v40 = vadd.f32 %v2298_v53, %v1544_v62  ;;  %v1243_v19 = vadd.f32 %v3253_v31, %v1056_v10  ;;  %v1414_v33 = vadd.f32 %v3303_v30, %v1245_v29  ;;  %v3488_v62 = vld [vmem:[#allocation14_spill] sm:$0xff]  ;;  %v3490_v38 = vld [vmem:[#allocation7_spill] sm:$0xff] }
 0x160   :  { %v1644_v42 = vpop.f32.mrf.mxu1  ;;  %v2322_v14 = vpop.f32.mrf.mxu0  ;;  %v1546_v31 = vadd.f32 %v3481_v13, %v1409_v26  ;;  %v1244_v30 = vadd.f32 %v3483_v55, %v1057_v32  ;;  %v1249_v8 = vadd.f32 %v3488_v62, %v1062_v34  ;;  %v3489_v23 = vld [vmem:[#allocation6_spill] sm:$0xff]  ;;  %v1247_v10 = vadd.f32 %v3493_v37, %v1060_v22 }
 0x161   :  { %1865 = vst [vmem:[#allocation2] sm:$0xff] %v1849_v9  ;;  %v1852_v21 = vadd.f32 %v2318_v18, %v1707_v40  ;;  %v1705_v59 = vadd.f32 %v1644_v42, %v1542_v43  ;;  %v3482_v18 = vld [vmem:[#allocation21_spill] sm:$0xff]  ;;  %v3494_v42 = vld [vmem:[#allocation10_spill] sm:$0xff] }
 0x162   :  { %v2301_v57 = vpop.f32.mrf.mxu1  ;;  %v1805_v27 = vpop.f32.mrf.mxu0  ;;  %v1412_v45 = vadd.f32 %v3482_v18, %v1243_v19  ;;  %v3492_v43 = vld [vmem:[#allocation25_spill] sm:$0xff]  ;;  %v1418_v29 = vadd.f32 %v3321_v24, %v1249_v8  ;;  %v1416_v32 = vadd.f32 %v3327_v12, %v1247_v10  ;;  %v3501_v18 = vld [vmem:[#allocation24_spill] sm:$0xff]  ;;  %v3502_v55 = vld [vmem:[#allocation26_spill] sm:$0xff] }
 0x163   :  { %1868 = vst [vmem:[#allocation2 + $0x18] sm:$0xff] %v1852_v21  ;;  %v1850_v16 = vadd.f32 %v1789_v20, %v1705_v59  ;;  %v1710_v4 = vadd.f32 %v2301_v57, %v1547_v15  ;;  %v3486_v20 = vld [vmem:[#allocation11_spill] sm:$0xff]  ;;  %v1413_v44 = vadd.f32 %v3492_v43, %v1244_v30  ;;  %v3495_v15 = vld [vmem:[#allocation17_spill] sm:$0xff] }
 0x164   :  { %v1657_v39 = vpop.f32.mrf.mxu1  ;;  %v2325_v52 = vpop.f32.mrf.mxu0  ;;  %v1551_v1 = vadd.f32 %v3486_v20, %v1414_v33  ;;  %v1549_v53 = vadd.f32 %v3491_v6, %v1412_v45  ;;  %v1061_v36 = vadd.f32 %v3495_v15, %v3494_v42  ;;  %v3496_v59 = vld [vmem:[#allocation19_spill] sm:$0xff]  ;;  %v3499_v33 = vld [vmem:[#allocation12_spill] sm:$0xff]  ;;  %v1555_v34 = vadd.f32 %v3500_v3, %v1418_v29 }
 0x165   :  { %1866 = vst [vmem:[#allocation2 + $0x8] sm:$0xff] %v1850_v16  ;;  %v1855_v50 = vadd.f32 %v2321_v11, %v1710_v4  ;;  %v1708_v46 = vadd.f32 %v1657_v39, %v1545_v35  ;;  %v1063_v11 = vadd.f32 %v3490_v38, %v3489_v23  ;;  %v3497_v35 = vld [vmem:[#allocation8_spill] sm:$0xff]  ;;  %v1553_v45 = vadd.f32 %v3501_v18, %v1416_v32 }
 0x166   :  { %v2302_v7 = vpop.f32.mrf.mxu1  ;;  %v1818_v61 = vpop.f32.mrf.mxu0 }
 0x167   :  { %1871 = vst [vmem:[#allocation2 + $0x30] sm:$0xff] %v1855_v50  ;;  %v1853_v58 = vadd.f32 %v1802_v28, %v1708_v46  ;;  %v1711_v17 = vadd.f32 %v2302_v7, %v1548_v0  ;;  %v1250_v26 = vadd.f32 %v3497_v35, %v1063_v11  ;;  %v1248_v50 = vadd.f32 %v3499_v33, %v1061_v36 }
 0x168   :  { %v1660_v56 = vpop.f32.mrf.mxu1  ;;  %v2326_v41 = vpop.f32.mrf.mxu0 }
 0x169   :  { %1869 = vst [vmem:[#allocation2 + $0x20] sm:$0xff] %v1853_v58  ;;  %v1856_v25 = vadd.f32 %v2322_v14, %v1711_v17  ;;  %v1709_v51 = vadd.f32 %v1660_v56, %v1546_v31  ;;  %v1552_v14 = vadd.f32 %v3496_v59, %v1415_v5  ;;  %v1419_v24 = vadd.f32 %v3331_v47, %v1250_v26  ;;  %v3503_v56 = vld [vmem:[#allocation27_spill] sm:$0xff] }
 0x16a   :  { %v2305_v60 = vpop.f32.mrf.mxu1  ;;  %v1821_v28 = vpop.f32.mrf.mxu0  ;;  %v1417_v58 = vadd.f32 %v3336_v49, %v1248_v50 }
 0x16b   :  { %1872 = vst [vmem:[#allocation2 + $0x38] sm:$0xff] %v1856_v25  ;;  %v1854_v9 = vadd.f32 %v1805_v27, %v1709_v51  ;;  %v1714_v40 = vadd.f32 %v2305_v60, %v1551_v1  ;;  %v3498_v27 = vld [vmem:[#allocation20_spill] sm:$0xff]  ;;  %v1556_v30 = vadd.f32 %v3502_v55, %v1419_v24 }
 0x16c   :  { %v1673_v21 = vpop.f32.mrf.mxu1  ;;  %v2329_v4 = vpop.f32.mrf.mxu0  ;;  %v1550_v19 = vadd.f32 %v3498_v27, %v1413_v44  ;;  %v1554_v20 = vadd.f32 %v3503_v56, %v1417_v58 }
 0x16d   :  { %1870 = vst [vmem:[#allocation2 + $0x28] sm:$0xff] %v1854_v9  ;;  %v1859_v63 = vadd.f32 %v2325_v52, %v1714_v40  ;;  %v1712_v57 = vadd.f32 %v1673_v21, %v1549_v53 }
 0x16e   :  { %v2306_v16 = vpop.f32.mrf.mxu1  ;;  %v1834_v31 = vpop.f32.mrf.mxu0 }
 0x16f   :  { %1875 = vst [vmem:[#allocation2 + $0x50] sm:$0xff] %v1859_v63  ;;  %v1857_v39 = vadd.f32 %v1818_v61, %v1712_v57  ;;  %v1715_v0 = vadd.f32 %v2306_v16, %v1552_v14 }
 0x170   :  { %v1676_v46 = vpop.f32.mrf.mxu1  ;;  %v2330_v47 = vpop.f32.mrf.mxu0 }
 0x171   :  { %1873 = vst [vmem:[#allocation2 + $0x40] sm:$0xff] %v1857_v39  ;;  %v1860_v52 = vadd.f32 %v2326_v41, %v1715_v0  ;;  %v1713_v7 = vadd.f32 %v1676_v46, %v1550_v19 }
 0x172   :  { %v2309_v13 = vpop.f32.mrf.mxu1  ;;  %v1837_v51 = vpop.f32.mrf.mxu0 }
 0x173   :  { %1876 = vst [vmem:[#allocation2 + $0x58] sm:$0xff] %v1860_v52  ;;  %v1858_v12 = vadd.f32 %v1821_v28, %v1713_v7  ;;  %v1718_v17 = vadd.f32 %v2309_v13, %v1555_v34 }
 0x174   :  { %v1689_v61 = vpop.f32.mrf.mxu1 }
 0x175   :  { %1874 = vst [vmem:[#allocation2 + $0x48] sm:$0xff] %v1858_v12  ;;  %v1863_v2 = vadd.f32 %v2329_v4, %v1718_v17  ;;  %v1716_v54 = vadd.f32 %v1689_v61, %v1553_v45 }
 0x176   :  { %v2310_v22 = vpop.f32.mrf.mxu1 }
 0x177   :  { %1879 = vst [vmem:[#allocation2 + $0x70] sm:$0xff] %v1863_v2  ;;  %v1861_v1 = vadd.f32 %v1834_v31, %v1716_v54  ;;  %v1719_v48 = vadd.f32 %v2310_v22, %v1556_v30 }
 0x178   :  { %v1692_v5 = vpop.f32.mrf.mxu1 }
 0x179   :  { %1877 = vst [vmem:[#allocation2 + $0x60] sm:$0xff] %v1861_v1  ;;  %v1864_v49 = vadd.f32 %v2330_v47, %v1719_v48  ;;  %v1717_v25 = vadd.f32 %v1692_v5, %v1554_v20 }
 0x17b   :  { %1880 = vst [vmem:[#allocation2 + $0x78] sm:$0xff] %v1864_v49  ;;  %v1862_v41 = vadd.f32 %v1837_v51, %v1717_v25 }
 0x17d   :  { %1878 = vst [vmem:[#allocation2 + $0x68] sm:$0xff] %v1862_v41 }
 0x17e   :  { %2385 = shalt.err (!%p2382_p4)
}
 0x17f   :  { %s2397_s14 = smov 128   ;;  %s2398_s15 = smov 8  }
 0x180   :  { %1892 = dma.vmem_to_hbm [thread:$0]  %s1887_s12, 2048, %s3398_s2, [#allocation3], %s2397_s14, %s2397_s14, %s2398_s15  }
 0x181   :  { %2394 = dma.done.wait [#allocation3], 2048  }
 0x182   :  { %2395 = vsyncadd [#allocation3], 4294965248 }
 0x183   :  { %1896 = vsyncpa [#allocation3], 1 }

</bundles_post_ra>
